<compile_context>
chip_gen: v7x
topology: tpu7x:2x2x1
jax: 0.10.0
libtpu: 0.0.40
codegen_flags: <defaults>
</compile_context>

<pallas_src>
import jax
import jax.numpy as jnp
from jax.experimental import pallas as pl
from jax.experimental.pallas import tpu as pltpu


def _round_up(x: int, m: int) -> int:
    return ((x + m - 1) // m) * m


def _vmem_capacity_bytes() -> int:
    """Per-TensorCore VMEM capacity (v5e/v6e: 128 MiB, v7x: 64 MiB)."""
    try:
        return int(pltpu.get_tpu_info().vmem_capacity_bytes)
    except Exception:
        return 64 << 20  # conservative fallback (v7x per-core)


def _choose_tn(hidden: int, itemsize: int, w_budget_bytes: int) -> int:
    """Output-column tile for the weight: full hidden if it fits the budget,
    else the largest multiple of 256 (or 128) that divides hidden and fits."""
    if hidden * hidden * itemsize <= w_budget_bytes:
        return hidden
    for step in (256, 128):
        best = 0
        for cand in range(step, hidden, step):
            if hidden % cand == 0 and hidden * cand * itemsize <= w_budget_bytes:
                best = cand
        if best:
            return best
    # TODO(synk): add a K (contraction) grid axis + f32 VMEM accumulator with
    # pl.when init/flush for hidden so large that even a 128-wide W slice
    # exceeds the per-core VMEM budget.
    return hidden


def residual_linear_kernel(x_ref, w_ref, b_ref, o_ref):
    """One (tm, tn) output tile: o = x @ W_slice + b_slice + x_slice.

    x_ref: (tm, hidden)  compute dtype (bf16)
    w_ref: (hidden, tn)  compute dtype, VMEM-resident slice
    b_ref: (1, tn)       float32
    o_ref: (tm, tn)      original input dtype
    """
    tn = o_ref.shape[-1]
    x = x_ref[...]
    # bf16 x bf16 on the MXU, f32 accumulation.
    y = jnp.dot(x, w_ref[...], preferred_element_type=jnp.float32)
    y = y + b_ref[...]
    if tn == x_ref.shape[-1]:
        x_res = x                                   # un-tiled hidden: residual = x
    else:
        # N-tiled: residual uses the matching column slice of x (tn | hidden,
        # tn a multiple of 128, so the slice is lane-aligned and in-bounds).
        col0 = pl.multiple_of(pl.program_id(0) * tn, 128)
        x_res = x_ref[:, pl.ds(col0, tn)]
    o_ref[...] = (y + x_res.astype(jnp.float32)).astype(o_ref.dtype)


def residual_linear(x, w_io, b, *, tm=None, tn=None, compute_dtype=jnp.bfloat16):
    """out = (x @ w_io + b) + x, fused in a single tiled Pallas kernel.

    x:    (batch, seq, hidden)
    w_io: (hidden_in, hidden_out)  -- Linear weight already transposed (out-of-hot-path)
    b:    (hidden,)
    """
    orig_dtype = x.dtype
    batch, seq, hidden = x.shape
    M = batch * seq

    # Cast once in the wrapper: MXU is bf16-native on all generations and this
    # halves HBM traffic + resident-W VMEM.  Accumulation stays f32 in-kernel.
    cdtype = compute_dtype if jnp.issubdtype(orig_dtype, jnp.floating) else orig_dtype
    x2d = x.reshape(M, hidden).astype(cdtype)
    w = w_io.astype(cdtype)
    b2d = b.reshape(1, hidden).astype(jnp.float32)

    itemsize = jnp.dtype(cdtype).itemsize
    out_itemsize = jnp.dtype(orig_dtype).itemsize
    vmem_cap = _vmem_capacity_bytes()              # per-TensorCore (megacore-safe)

    # --- Weight (N) tiling: bound resident W to ~35% of per-core VMEM. ------
    if tn is None:
        tn = _choose_tn(hidden, itemsize, int(0.35 * vmem_cap))

    # --- Row tile: ~2 MiB per x tile, MXU-friendly multiples where possible.
    if tm is None:
        target_x_tile_bytes = 2 << 20
        raw = max(8, target_x_tile_bytes // (hidden * itemsize))
        if raw >= 256:
            tm = min(_round_up(raw, 256), 2048)     # 256-mult feeds v6e/v7x MXU fully
        else:
            tm = _round_up(raw, 8)                  # huge hidden: keep the tile legal
        tm = min(tm, _round_up(M, 8))               # don't over-allocate for small M
    assert tm % 8 == 0, "row tile must be a multiple of 8 (sublane packing)"

    n_tiles = pl.cdiv(hidden, tn)
    m_tiles = pl.cdiv(M, tm)                        # ragged last block handled by Pallas

    def _vmem_limit(w_buffers: int) -> int:
        footprint = (2 * tm * hidden * itemsize          # x tile, double-buffered
                     + 2 * tm * tn * out_itemsize        # out tile, double-buffered
                     + w_buffers * hidden * tn * itemsize  # resident W slice
                     + 2 * tn * 4)                       # bias slice
        return int(min(max(1.25 * footprint + (4 << 20), 16 << 20), 0.9 * vmem_cap))

    cost = pl.CostEstimate(
        flops=2 * M * hidden * hidden + 2 * M * hidden,
        transcendentals=0,
        bytes_accessed=(n_tiles * M * hidden * itemsize    # x read once per N slice
                        + hidden * hidden * itemsize       # W read once
                        + hidden * 4                        # bias
                        + M * hidden * out_itemsize),       # output write
    )

    def build_call(single_buffer_resident: bool):
        resident = dict(pipeline_mode=pl.Buffered(1)) if single_buffer_resident else {}
        return pl.pallas_call(
            residual_linear_kernel,
            out_shape=jax.ShapeDtypeStruct((M, hidden), orig_dtype),
            grid=(n_tiles, m_tiles),                 # N outermost: W slice changes rarely
            in_specs=[
                pl.BlockSpec((tm, hidden), lambda j, i: (i, 0)),             # x: steps over M
                pl.BlockSpec((hidden, tn), lambda j, i: (0, j), **resident),  # W slice: resident
                pl.BlockSpec((1, tn), lambda j, i: (0, j), **resident),       # bias slice
            ],
            out_specs=pl.BlockSpec((tm, tn), lambda j, i: (i, j)),
            compiler_params=pltpu.CompilerParams(
                dimension_semantics=("parallel", "parallel"),   # no revisits on either axis
                vmem_limit_bytes=_vmem_limit(1 if single_buffer_resident else 2),
            ),
            cost_estimate=cost,
        )

    try:
        out2d = build_call(True)(x2d, w, b2d)
    except Exception:
        # Fallback for jax builds without pipeline_mode / Buffered(1): default
        # double buffering (costs extra VMEM for W, identical results).
        out2d = build_call(False)(x2d, w, b2d)

    return out2d.reshape(batch, seq, hidden)


if __name__ == "__main__":
    key = jax.random.PRNGKey(0)
    k_x, k_w, k_b = jax.random.split(key, 3)

    # Small demo shapes; M=40 with tm=16 exercises the multi-tile + ragged path.
    batch, seq, hidden = 2, 20, 128
    x = jax.random.normal(k_x, (batch, seq, hidden), dtype=jnp.float32)

    # Deterministic "Linear" parameters. PyTorch Linear weight is (out, in);
    # transpose ONCE here (outside the hot path) to (in, out) for the kernel.
    w_oi = jax.random.normal(k_w, (hidden, hidden), dtype=jnp.float32) * 0.02
    b = jax.random.normal(k_b, (hidden,), dtype=jnp.float32) * 0.02
    w_io = w_oi.T

    out_auto = jax.block_until_ready(residual_linear(x, w_io, b))        # auto tile plan
    out_ragged = jax.block_until_ready(residual_linear(x, w_io, b, tm=16))  # ragged M blocks

    # Reference: fn(x) + x using the same bf16-rounded inputs the kernel sees
    # (f32 accumulation in both), so only MXU-vs-XLA summation order differs.
    xb = x.astype(jnp.bfloat16).astype(jnp.float32)
    wb = w_io.astype(jnp.bfloat16).astype(jnp.float32)
    ref = ((xb.reshape(-1, hidden) @ wb + b) + xb.reshape(-1, hidden)).reshape(x.shape)

    assert jnp.allclose(out_auto, ref, atol=2e-2, rtol=2e-2), "auto-tile mismatch vs reference"
    assert jnp.allclose(out_ragged, ref, atol=2e-2, rtol=2e-2), "ragged-tile mismatch vs reference"
    print("KERNEL_OK")
</pallas_src>

<mosaic_0001>
module attributes {stable_mosaic.version = 11 : i64} {
  func.func @residual_linear_kernel(%arg0: i32, %arg1: i32, %arg2: memref<40x128xbf16, #tpu.memory_space<vmem>>, %arg3: memref<128x128xbf16, #tpu.memory_space<vmem>>, %arg4: memref<1x128xf32, #tpu.memory_space<vmem>>, %arg5: memref<40x128xf32, #tpu.memory_space<vmem>>) attributes {dimension_semantics = [#tpu.dimension_semantics<parallel>, #tpu.dimension_semantics<parallel>], iteration_bounds = array<i64: 1, 1>, scalar_prefetch = 0 : i64, scratch_operands = 0 : i64, tpu.core_type = #tpu.core_type<tc>, window_params = [{transform_indices = @transform_0, window_bounds = array<i64: 40, 128>}, {pipeline_mode = #tpu.pipeline_mode<synchronous>, transform_indices = @transform_1, window_bounds = array<i64: 128, 128>}, {pipeline_mode = #tpu.pipeline_mode<synchronous>, transform_indices = @transform_2, window_bounds = array<i64: 1, 128>}, {transform_indices = @transform_3, window_bounds = array<i64: 40, 128>}]} {
    %c0 = arith.constant 0 : index
    %c0_0 = arith.constant 0 : index
    %0 = vector.load %arg2[%c0, %c0_0] : memref<40x128xbf16, #tpu.memory_space<vmem>>, vector<40x128xbf16>
    %c0_1 = arith.constant 0 : index
    %c0_2 = arith.constant 0 : index
    %1 = vector.load %arg3[%c0_1, %c0_2] : memref<128x128xbf16, #tpu.memory_space<vmem>>, vector<128x128xbf16>
    %cst = arith.constant dense<0.000000e+00> : vector<40x128xf32>
    %2 = tpu.matmul %0, %1, %cst {dimension_numbers = #tpu.dot_dimension_numbers<[1], [0], [0], [1], [0, 0, 1, 1], [], []>} : vector<40x128xbf16>, vector<128x128xbf16>, vector<40x128xf32> -> vector<40x128xf32>
    %c0_3 = arith.constant 0 : index
    %c0_4 = arith.constant 0 : index
    %3 = vector.load %arg4[%c0_3, %c0_4] : memref<1x128xf32, #tpu.memory_space<vmem>>, vector<1x128xf32>
    %4 = vector.broadcast %3 : vector<1x128xf32> to vector<40x128xf32>
    %5 = arith.addf %2, %4 : vector<40x128xf32>
    %6 = arith.extf %0 : vector<40x128xbf16> to vector<40x128xf32>
    %7 = arith.addf %5, %6 : vector<40x128xf32>
    %c0_5 = arith.constant 0 : index
    %c0_6 = arith.constant 0 : index
    %8 = vector.load %arg5[%c0_5, %c0_6] : memref<40x128xf32, #tpu.memory_space<vmem>>, vector<40x128xf32>
    tpu.vector_store %arg5[%c0_5, %c0_6], %7 {strides = array<i32>} : memref<40x128xf32, #tpu.memory_space<vmem>>, vector<40x128xf32>,
    return
  }
  func.func @transform_0(%arg0: i32, %arg1: i32) -> (i32, i32) {
    %c0_i32 = arith.constant 0 : i32
    %c0_i32_0 = arith.constant 0 : i32
    return %arg1, %c0_i32 : i32, i32
  }
  func.func @transform_1(%arg0: i32, %arg1: i32) -> (i32, i32) {
    %c0_i32 = arith.constant 0 : i32
    %c0_i32_0 = arith.constant 0 : i32
    return %c0_i32, %arg0 : i32, i32
  }
  func.func @transform_2(%arg0: i32, %arg1: i32) -> (i32, i32) {
    %c0_i32 = arith.constant 0 : i32
    %c0_i32_0 = arith.constant 0 : i32
    return %c0_i32, %arg0 : i32, i32
  }
  func.func @transform_3(%arg0: i32, %arg1: i32) -> (i32, i32) {
    %c0_i32 = arith.constant 0 : i32
    return %arg1, %arg0 : i32, i32
  }
}

module attributes {stable_mosaic.version = 11 : i64} {
  func.func @residual_linear_kernel(%arg0: i32, %arg1: i32, %arg2: memref<40x128xbf16, #tpu.memory_space<vmem>>, %arg3: memref<128x128xbf16, #tpu.memory_space<vmem>>, %arg4: memref<1x128xf32, #tpu.memory_space<vmem>>, %arg5: memref<40x128xf32, #tpu.memory_space<vmem>>) attributes {dimension_semantics = [#tpu.dimension_semantics<parallel>, #tpu.dimension_semantics<parallel>], iteration_bounds = array<i64: 1, 1>, scalar_prefetch = 0 : i64, scratch_operands = 0 : i64, tpu.core_type = #tpu.core_type<tc>, window_params = [{transform_indices = @transform_0, window_bounds = array<i64: 40, 128>}, {transform_indices = @transform_1, window_bounds = array<i64: 128, 128>}, {transform_indices = @transform_2, window_bounds = array<i64: 1, 128>}, {transform_indices = @transform_3, window_bounds = array<i64: 40, 128>}]} {
    %c0 = arith.constant 0 : index
    %c0_0 = arith.constant 0 : index
    %0 = vector.load %arg2[%c0, %c0_0] : memref<40x128xbf16, #tpu.memory_space<vmem>>, vector<40x128xbf16>
    %c0_1 = arith.constant 0 : index
    %c0_2 = arith.constant 0 : index
    %1 = vector.load %arg3[%c0_1, %c0_2] : memref<128x128xbf16, #tpu.memory_space<vmem>>, vector<128x128xbf16>
    %cst = arith.constant dense<0.000000e+00> : vector<40x128xf32>
    %2 = tpu.matmul %0, %1, %cst {dimension_numbers = #tpu.dot_dimension_numbers<[1], [0], [0], [1], [0, 0, 1, 1], [], []>} : vector<40x128xbf16>, vector<128x128xbf16>, vector<40x128xf32> -> vector<40x128xf32>
    %c0_3 = arith.constant 0 : index
    %c0_4 = arith.constant 0 : index
    %3 = vector.load %arg4[%c0_3, %c0_4] : memref<1x128xf32, #tpu.memory_space<vmem>>, vector<1x128xf32>
    %4 = vector.broadcast %3 : vector<1x128xf32> to vector<40x128xf32>
    %5 = arith.addf %2, %4 : vector<40x128xf32>
    %6 = arith.extf %0 : vector<40x128xbf16> to vector<40x128xf32>
    %7 = arith.addf %5, %6 : vector<40x128xf32>
    %c0_5 = arith.constant 0 : index
    %c0_6 = arith.constant 0 : index
    %8 = vector.load %arg5[%c0_5, %c0_6] : memref<40x128xf32, #tpu.memory_space<vmem>>, vector<40x128xf32>
    tpu.vector_store %arg5[%c0_5, %c0_6], %7 {strides = array<i32>} : memref<40x128xf32, #tpu.memory_space<vmem>>, vector<40x128xf32>,
    return
  }
  func.func @transform_0(%arg0: i32, %arg1: i32) -> (i32, i32) {
    %c0_i32 = arith.constant 0 : i32
    %c0_i32_0 = arith.constant 0 : i32
    return %arg1, %c0_i32 : i32, i32
  }
  func.func @transform_1(%arg0: i32, %arg1: i32) -> (i32, i32) {
    %c0_i32 = arith.constant 0 : i32
    %c0_i32_0 = arith.constant 0 : i32
    return %c0_i32, %arg0 : i32, i32
  }
  func.func @transform_2(%arg0: i32, %arg1: i32) -> (i32, i32) {
    %c0_i32 = arith.constant 0 : i32
    %c0_i32_0 = arith.constant 0 : i32
    return %c0_i32, %arg0 : i32, i32
  }
  func.func @transform_3(%arg0: i32, %arg1: i32) -> (i32, i32) {
    %c0_i32 = arith.constant 0 : i32
    return %arg1, %arg0 : i32, i32
  }
}

</mosaic_0001>

<bundles_post_ra>
// kernel: tpu_custom_call.1
= control target key start
LH: loop header
LB: loop body
LE: loop exit
PB: predicated region body
PF: predicated region fallthrough
CT: control target
= control target key end

     0   :  { %8 = vsyncpa [#allocation3], 0  ;;  %s457_s0 = inlined_call_operand.hbm [shape: bf16[40,128], index: 0, kind: input, shape index: {}]   ;;  %s458_s1 = inlined_call_operand.hbm [shape: bf16[128,128], index: 1, kind: input, shape index: {}]   ;;  %s459_s2 = inlined_call_operand.vmem [shape: f32[1,128], index: 2, kind: input, shape index: {}]   ;;  %s460_s3 = inlined_call_operand.hbm [shape: f32[40,128], index: 3, kind: output, shape index: {}]  }
   0x1   :  { %9 = vsyncpa [#allocation6], 0 }
   0x2   :  { %10 = vsyncpa [#allocation4], 0  ;;  %s386_s12 = smov [#allocation2]   ;;  %s314_s16 = scalar_lea.hbm %s457_s0, 320 }
   0x3   :  { %s16_s13 = sshll.u32 %s386_s12, 4  ;;  %p315_p0 = scmp.ne.s32.totalorder %s457_s0, %s314_s16  ;;  %s17_s13 = int_to_ptr.vmem [resolvable:$true] %s16_s13 }
   0x4   :  { %p318_p1 = scmp.lt.u32.totalorder %s314_s16, %s457_s0 }
   0x6   :  { %p320_p2 = pnand %p318_p1, %p315_p0 }
   0x8   :  { %323 = shalt.err (!%p320_p2)
}
   0x9   :  { %s324_s21 = scalar_lea.vmem %s17_s13, 320  ;;  %p329_p4 = scmp.lt.s32.totalorder %s17_s13, %s17_s13 }
   0xa   :  { %p325_p3 = scmp.ne.s32.totalorder %s17_s13, %s324_s21  ;;  %p330_p5 = scmp.lt.s32.totalorder %s324_s21, %s324_s21 }
   0xc   :  { %p331_p6 = por %p330_p5, %p329_p4 }
   0xe   :  { %p332_p7 = pnand %p331_p6, %p325_p3 }
  0x10   :  { %335 = shalt.err (!%p332_p7)
}
  0x11   :  { %s387_s22 = smov 64   ;;  %s388_s23 = smov 4  }
  0x12   :  { %22 = dma.hbm_to_vmem [thread:$0]  %s457_s0, 320, %s17_s13, [#allocation3], %s387_s22, %s387_s22, %s388_s23  }
  0x13   :  { %s389_s26 = smov [#allocation5]   ;;  %s336_s30 = scalar_lea.hbm %s458_s1, 1024 }
  0x14   :  { %s28_s27 = sshll.u32 %s389_s26, 4  ;;  %p337_p8 = scmp.ne.s32.totalorder %s458_s1, %s336_s30  ;;  %s29_s27 = int_to_ptr.vmem [resolvable:$true] %s28_s27 }
  0x15   :  { %p340_p9 = scmp.lt.u32.totalorder %s336_s30, %s458_s1 }
  0x17   :  { %p342_p10 = pnand %p340_p9, %p337_p8 }
  0x19   :  { %345 = shalt.err (!%p342_p10)
}
  0x1a   :  { %s346_s8 = scalar_lea.vmem %s29_s27, 1024  ;;  %p351_p12 = scmp.lt.s32.totalorder %s29_s27, %s29_s27 }
  0x1b   :  { %p347_p11 = scmp.ne.s32.totalorder %s29_s27, %s346_s8  ;;  %p352_p13 = scmp.lt.s32.totalorder %s346_s8, %s346_s8 }
  0x1d   :  { %p353_p0 = por %p352_p13, %p351_p12 }
  0x1f   :  { %p354_p1 = pnand %p353_p0, %p347_p11 }
  0x21   :  { %357 = shalt.err (!%p354_p1)
}
  0x22   :  { %34 = dma.hbm_to_vmem [thread:$0]  %s458_s1, 1024, %s29_s27, [#allocation6], %s387_s22, %s387_s22, %s388_s23  }
  0x23   :  { %380 = dma.done.wait [#allocation3], 320  }
  0x24   :  { %381 = vsyncadd [#allocation3], 4294966976 }
  0x25   :  { %382 = dma.done.wait [#allocation6], 1024  }
  0x26   :  { %383 = vsyncadd [#allocation6], 4294966272  ;;  %v390_v0 = vmov 0.0   ;;  %vm391_vm0 = vmmov 0   ;;  %v301_v1 = vld [vmem:[#allocation5] sm:$0xff]   ;;  %v302_v2 = vld [vmem:[#allocation5 + $0x8] sm:$0xff]  }
  0x27   :  { %276 = vmatprep.subr.bf16.mxu1 %v390_v0  ;;  %248 = vmatprep.subr.bf16.mxu0 %v390_v0  ;;  %v303_v3 = vld [vmem:[#allocation5 + $0x10] sm:$0xff]   ;;  %v304_v4 = vld [vmem:[#allocation5 + $0x18] sm:$0xff]   ;;  %v305_v5 = vld [vmem:[#allocation5 + $0x20] sm:$0xff]  }
  0x28   :  { %268 = vmatprep.mubr.msk.bf16.mxu1 %vm391_vm0, %v390_v0  ;;  %264 = vmatprep.mubr.msk.bf16.mxu0 %vm391_vm0, %v390_v0  ;;  %v306_v6 = vld [vmem:[#allocation5 + $0x28] sm:$0xff]   ;;  %v307_v7 = vld [vmem:[#allocation5 + $0x30] sm:$0xff]   ;;  %v308_v8 = vld [vmem:[#allocation5 + $0x38] sm:$0xff]  }
  0x29   :  { %284 = vmatpush3.bf16.msra.mxu1 %v301_v1  ;;  %249 = vmatpush3.bf16.msra.mxu0 %v301_v1  ;;  %v46_v9 = vld [vmem:[#allocation2 + $0x8] sm:$0xff]   ;;  %v44_v10 = vld [vmem:[#allocation2] sm:$0xff]   ;;  %v48_v11 = vld [vmem:[#allocation2 + $0x10] sm:$0xf] }
  0x2a   :  { %277 = vmatprep.subr.bf16.mxu1 %v390_v0  ;;  %250 = vmatprep.subr.bf16.mxu0 %v390_v0  ;;  %v228_v12 = vcombine.low %v48_v11, %v48_v11  ;;  %v225_v13 = vld [vmem:[%s459_s2] ss:$0 sm:$0xff]  ;;  %v194_v14 = vunpack.c.l.bf16 %v46_v9  ;;  %v192_v15 = vunpack.c.l.bf16 %v44_v10  ;;  %v195_v20 = vunpack.c.h.bf16 %v46_v9  ;;  %s392_s2 = smov [#allocation7]  }
  0x2b   :  { %v193_v23 = vunpack.c.h.bf16 %v44_v10  ;;  %v196_v34 = vunpack.c.l.bf16 %v48_v11  ;;  %s212_s11 = sshll.u32 %s392_s2, 4  ;;  %s213_s11 = int_to_ptr.vmem [resolvable:$true] %s212_s11 }
  0x2c   :  { %s358_s12 = scalar_lea.vmem %s213_s11, 640  ;;  %p363_p3 = scmp.lt.s32.totalorder %s213_s11, %s213_s11 }
  0x2d   :  { %285 = vmatpush3.bf16.msra.mxu1 %v302_v2  ;;  %251 = vmatpush3.bf16.msra.mxu0 %v302_v2  ;;  %p359_p2 = scmp.ne.s32.totalorder %s213_s11, %s358_s12  ;;  %p364_p4 = scmp.lt.s32.totalorder %s358_s12, %s358_s12 }
  0x2e   :  { %278 = vmatprep.subr.bf16.mxu1 %v390_v0  ;;  %252 = vmatprep.subr.bf16.mxu0 %v390_v0 }
  0x2f   :  { %p365_p5 = por %p364_p4, %p363_p3 }
  0x31   :  { %286 = vmatpush3.bf16.msra.mxu1 %v303_v3  ;;  %253 = vmatpush3.bf16.msra.mxu0 %v303_v3  ;;  %p366_p6 = pnand %p365_p5, %p359_p2 }
  0x32   :  { %279 = vmatprep.subr.bf16.mxu1 %v390_v0  ;;  %254 = vmatprep.subr.bf16.mxu0 %v390_v0 }
  0x35   :  { %287 = vmatpush3.bf16.msra.mxu1 %v304_v4  ;;  %255 = vmatpush3.bf16.msra.mxu0 %v304_v4 }
  0x36   :  { %280 = vmatprep.subr.bf16.mxu1 %v390_v0  ;;  %256 = vmatprep.subr.bf16.mxu0 %v390_v0 }
  0x39   :  { %288 = vmatpush3.bf16.msra.mxu1 %v305_v5  ;;  %257 = vmatpush3.bf16.msra.mxu0 %v305_v5 }
  0x3a   :  { %281 = vmatprep.subr.bf16.mxu1 %v390_v0  ;;  %258 = vmatprep.subr.bf16.mxu0 %v390_v0 }
  0x3d   :  { %289 = vmatpush3.bf16.msra.mxu1 %v306_v6  ;;  %259 = vmatpush3.bf16.msra.mxu0 %v306_v6 }
  0x3e   :  { %282 = vmatprep.subr.bf16.mxu1 %v390_v0  ;;  %260 = vmatprep.subr.bf16.mxu0 %v390_v0 }
  0x41   :  { %290 = vmatpush3.bf16.msra.mxu1 %v307_v7  ;;  %261 = vmatpush3.bf16.msra.mxu0 %v307_v7 }
  0x42   :  { %283 = vmatprep.subr.bf16.mxu1 %v390_v0  ;;  %262 = vmatprep.subr.bf16.mxu0 %v390_v0 }
  0x45   :  { %291 = vmatpush3.bf16.msra.mxu1 %v308_v8  ;;  %263 = vmatpush3.bf16.msra.mxu0 %v308_v8 }
  0x48   :  { %269 = vmatmul.mubr.bf16.vlgmr.msra.gmra.mrb[0].mxu1 %v46_v9  ;;  %265 = vmatmul.mubr.bf16.vlgmr.msra.gmra.mrb[0].mxu0 %v44_v10 }
  0x49   :  { %272 = vmatprep.mubr.msk.bf16.mxu1 %vm391_vm0, %v390_v0 }
  0x50   :  { %273 = vmatmul.mubr.bf16.gmra.mrb[4].mxu1 %v228_v12 }
 0x11b   :  { %v178_v16 = vpop.f32.mrb[0].mxu1  ;;  %v170_v17 = vpop.f32.mrb[0].mxu0 }
 0x11c   :  { %v179_v18 = vadd.f32 %v225_v13, %v178_v16  ;;  %v270_v19 = vpop.f32.mrb[1].mxu1  ;;  %v171_v21 = vadd.f32 %v225_v13, %v170_v17  ;;  %v266_v22 = vpop.f32.mrb[1].mxu0 }
 0x11d   :  { %v181_v24 = vpop.f32.mrb[2].mxu1  ;;  %v173_v25 = vpop.f32.mrb[2].mxu0 }
 0x11e   :  { %v199_v26 = vadd.f32 %v194_v14, %v179_v18  ;;  %v182_v27 = vadd.f32 %v225_v13, %v181_v24  ;;  %v197_v28 = vadd.f32 %v192_v15, %v171_v21  ;;  %v271_v29 = vpop.f32.mrb[3].mxu1  ;;  %v174_v30 = vadd.f32 %v225_v13, %v173_v25  ;;  %v267_v31 = vpop.f32.mrb[3].mxu0 }
 0x120   :  { %204 = vst [vmem:[#allocation7 + $0x10] sm:$0xff] %v199_v26  ;;  %v200_v32 = vadd.f32 %v195_v20, %v182_v27  ;;  %202 = vst [vmem:[#allocation7] sm:$0xff] %v197_v28  ;;  %v198_v33 = vadd.f32 %v193_v23, %v174_v30 }
 0x122   :  { %205 = vst [vmem:[#allocation7 + $0x18] sm:$0xff] %v200_v32  ;;  %203 = vst [vmem:[#allocation7 + $0x8] sm:$0xff] %v198_v33 }
 0x123   :  { %v186_v35 = vpop.f32.mrb[4].mxu1 }
 0x124   :  { %v187_v36 = vadd.f32 %v225_v13, %v186_v35  ;;  %v274_v37 = vpop.f32.mrb[5].mxu1 }
 0x125   :  { %v189_v38 = vpop.f32.mrb[6].mxu1 }
 0x126   :  { %v201_v39 = vadd.f32 %v196_v34, %v187_v36  ;;  %v275_v40 = vpop.f32.mrb[7].mxu1 }
 0x128   :  { %206 = vst [vmem:[#allocation7 + $0x20] sm:$0xff] %v201_v39 }
 0x129   :  { %369 = shalt.err (!%p366_p6)
}
 0x12a   :  { %s370_s15 = scalar_lea.hbm %s460_s3, 640 }
 0x12b   :  { %p371_p7 = scmp.ne.s32.totalorder %s460_s3, %s370_s15  ;;  %p374_p8 = scmp.lt.u32.totalorder %s370_s15, %s460_s3 }
 0x12d   :  { %p376_p9 = pnand %p374_p8, %p371_p7 }
 0x12f   :  { %379 = shalt.err (!%p376_p9)
}
 0x130   :  { %s393_s20 = smov 128   ;;  %s394_s21 = smov 8  }
 0x131   :  { %218 = dma.vmem_to_hbm [thread:$0]  %s213_s11, 640, %s460_s3, [#allocation4], %s393_s20, %s393_s20, %s394_s21  }
 0x132   :  { %384 = dma.done.wait [#allocation4], 640  }
 0x133   :  { %385 = vsyncadd [#allocation4], 4294966656 }
 0x134   :  { %222 = vsyncpa [#allocation3], 1 }
 0x135   :  { %223 = vsyncpa [#allocation6], 1 }
 0x136   :  { %224 = vsyncpa [#allocation4], 1 }

// kernel: tpu_custom_call.1
= control target key start
LH: loop header
LB: loop body
LE: loop exit
PB: predicated region body
PF: predicated region fallthrough
CT: control target
= control target key end

     0   :  { %8 = vsyncpa [#allocation3], 0  ;;  %s457_s0 = inlined_call_operand.hbm [shape: bf16[40,128], index: 0, kind: input, shape index: {}]   ;;  %s458_s1 = inlined_call_operand.hbm [shape: bf16[128,128], index: 1, kind: input, shape index: {}]   ;;  %s459_s2 = inlined_call_operand.vmem [shape: f32[1,128], index: 2, kind: input, shape index: {}]   ;;  %s460_s3 = inlined_call_operand.hbm [shape: f32[40,128], index: 3, kind: output, shape index: {}]  }
   0x1   :  { %9 = vsyncpa [#allocation6], 0 }
   0x2   :  { %10 = vsyncpa [#allocation4], 0  ;;  %s386_s12 = smov [#allocation2]   ;;  %s314_s16 = scalar_lea.hbm %s457_s0, 320 }
   0x3   :  { %s16_s13 = sshll.u32 %s386_s12, 4  ;;  %p315_p0 = scmp.ne.s32.totalorder %s457_s0, %s314_s16  ;;  %s17_s13 = int_to_ptr.vmem [resolvable:$true] %s16_s13 }
   0x4   :  { %p318_p1 = scmp.lt.u32.totalorder %s314_s16, %s457_s0 }
   0x6   :  { %p320_p2 = pnand %p318_p1, %p315_p0 }
   0x8   :  { %323 = shalt.err (!%p320_p2)
}
   0x9   :  { %s324_s21 = scalar_lea.vmem %s17_s13, 320  ;;  %p329_p4 = scmp.lt.s32.totalorder %s17_s13, %s17_s13 }
   0xa   :  { %p325_p3 = scmp.ne.s32.totalorder %s17_s13, %s324_s21  ;;  %p330_p5 = scmp.lt.s32.totalorder %s324_s21, %s324_s21 }
   0xc   :  { %p331_p6 = por %p330_p5, %p329_p4 }
   0xe   :  { %p332_p7 = pnand %p331_p6, %p325_p3 }
  0x10   :  { %335 = shalt.err (!%p332_p7)
}
  0x11   :  { %s387_s22 = smov 64   ;;  %s388_s23 = smov 4  }
  0x12   :  { %22 = dma.hbm_to_vmem [thread:$0]  %s457_s0, 320, %s17_s13, [#allocation3], %s387_s22, %s387_s22, %s388_s23  }
  0x13   :  { %s389_s26 = smov [#allocation5]   ;;  %s336_s30 = scalar_lea.hbm %s458_s1, 1024 }
  0x14   :  { %s28_s27 = sshll.u32 %s389_s26, 4  ;;  %p337_p8 = scmp.ne.s32.totalorder %s458_s1, %s336_s30  ;;  %s29_s27 = int_to_ptr.vmem [resolvable:$true] %s28_s27 }
  0x15   :  { %p340_p9 = scmp.lt.u32.totalorder %s336_s30, %s458_s1 }
  0x17   :  { %p342_p10 = pnand %p340_p9, %p337_p8 }
  0x19   :  { %345 = shalt.err (!%p342_p10)
}
  0x1a   :  { %s346_s8 = scalar_lea.vmem %s29_s27, 1024  ;;  %p351_p12 = scmp.lt.s32.totalorder %s29_s27, %s29_s27 }
  0x1b   :  { %p347_p11 = scmp.ne.s32.totalorder %s29_s27, %s346_s8  ;;  %p352_p13 = scmp.lt.s32.totalorder %s346_s8, %s346_s8 }
  0x1d   :  { %p353_p0 = por %p352_p13, %p351_p12 }
  0x1f   :  { %p354_p1 = pnand %p353_p0, %p347_p11 }
  0x21   :  { %357 = shalt.err (!%p354_p1)
}
  0x22   :  { %34 = dma.hbm_to_vmem [thread:$0]  %s458_s1, 1024, %s29_s27, [#allocation6], %s387_s22, %s387_s22, %s388_s23  }
  0x23   :  { %380 = dma.done.wait [#allocation3], 320  }
  0x24   :  { %381 = vsyncadd [#allocation3], 4294966976 }
  0x25   :  { %382 = dma.done.wait [#allocation6], 1024  }
  0x26   :  { %383 = vsyncadd [#allocation6], 4294966272  ;;  %v390_v0 = vmov 0.0   ;;  %vm391_vm0 = vmmov 0   ;;  %v301_v1 = vld [vmem:[#allocation5] sm:$0xff]   ;;  %v302_v2 = vld [vmem:[#allocation5 + $0x8] sm:$0xff]  }
  0x27   :  { %276 = vmatprep.subr.bf16.mxu1 %v390_v0  ;;  %248 = vmatprep.subr.bf16.mxu0 %v390_v0  ;;  %v303_v3 = vld [vmem:[#allocation5 + $0x10] sm:$0xff]   ;;  %v304_v4 = vld [vmem:[#allocation5 + $0x18] sm:$0xff]   ;;  %v305_v5 = vld [vmem:[#allocation5 + $0x20] sm:$0xff]  }
  0x28   :  { %268 = vmatprep.mubr.msk.bf16.mxu1 %vm391_vm0, %v390_v0  ;;  %264 = vmatprep.mubr.msk.bf16.mxu0 %vm391_vm0, %v390_v0  ;;  %v306_v6 = vld [vmem:[#allocation5 + $0x28] sm:$0xff]   ;;  %v307_v7 = vld [vmem:[#allocation5 + $0x30] sm:$0xff]   ;;  %v308_v8 = vld [vmem:[#allocation5 + $0x38] sm:$0xff]  }
  0x29   :  { %284 = vmatpush3.bf16.msra.mxu1 %v301_v1  ;;  %249 = vmatpush3.bf16.msra.mxu0 %v301_v1  ;;  %v46_v9 = vld [vmem:[#allocation2 + $0x8] sm:$0xff]   ;;  %v44_v10 = vld [vmem:[#allocation2] sm:$0xff]   ;;  %v48_v11 = vld [vmem:[#allocation2 + $0x10] sm:$0xf] }
  0x2a   :  { %277 = vmatprep.subr.bf16.mxu1 %v390_v0  ;;  %250 = vmatprep.subr.bf16.mxu0 %v390_v0  ;;  %v228_v12 = vcombine.low %v48_v11, %v48_v11  ;;  %v225_v13 = vld [vmem:[%s459_s2] ss:$0 sm:$0xff]  ;;  %v194_v14 = vunpack.c.l.bf16 %v46_v9  ;;  %v192_v15 = vunpack.c.l.bf16 %v44_v10  ;;  %v195_v20 = vunpack.c.h.bf16 %v46_v9  ;;  %s392_s2 = smov [#allocation7]  }
  0x2b   :  { %v193_v23 = vunpack.c.h.bf16 %v44_v10  ;;  %v196_v34 = vunpack.c.l.bf16 %v48_v11  ;;  %s212_s11 = sshll.u32 %s392_s2, 4  ;;  %s213_s11 = int_to_ptr.vmem [resolvable:$true] %s212_s11 }
  0x2c   :  { %s358_s12 = scalar_lea.vmem %s213_s11, 640  ;;  %p363_p3 = scmp.lt.s32.totalorder %s213_s11, %s213_s11 }
  0x2d   :  { %285 = vmatpush3.bf16.msra.mxu1 %v302_v2  ;;  %251 = vmatpush3.bf16.msra.mxu0 %v302_v2  ;;  %p359_p2 = scmp.ne.s32.totalorder %s213_s11, %s358_s12  ;;  %p364_p4 = scmp.lt.s32.totalorder %s358_s12, %s358_s12 }
  0x2e   :  { %278 = vmatprep.subr.bf16.mxu1 %v390_v0  ;;  %252 = vmatprep.subr.bf16.mxu0 %v390_v0 }
  0x2f   :  { %p365_p5 = por %p364_p4, %p363_p3 }
  0x31   :  { %286 = vmatpush3.bf16.msra.mxu1 %v303_v3  ;;  %253 = vmatpush3.bf16.msra.mxu0 %v303_v3  ;;  %p366_p6 = pnand %p365_p5, %p359_p2 }
  0x32   :  { %279 = vmatprep.subr.bf16.mxu1 %v390_v0  ;;  %254 = vmatprep.subr.bf16.mxu0 %v390_v0 }
  0x35   :  { %287 = vmatpush3.bf16.msra.mxu1 %v304_v4  ;;  %255 = vmatpush3.bf16.msra.mxu0 %v304_v4 }
  0x36   :  { %280 = vmatprep.subr.bf16.mxu1 %v390_v0  ;;  %256 = vmatprep.subr.bf16.mxu0 %v390_v0 }
  0x39   :  { %288 = vmatpush3.bf16.msra.mxu1 %v305_v5  ;;  %257 = vmatpush3.bf16.msra.mxu0 %v305_v5 }
  0x3a   :  { %281 = vmatprep.subr.bf16.mxu1 %v390_v0  ;;  %258 = vmatprep.subr.bf16.mxu0 %v390_v0 }
  0x3d   :  { %289 = vmatpush3.bf16.msra.mxu1 %v306_v6  ;;  %259 = vmatpush3.bf16.msra.mxu0 %v306_v6 }
  0x3e   :  { %282 = vmatprep.subr.bf16.mxu1 %v390_v0  ;;  %260 = vmatprep.subr.bf16.mxu0 %v390_v0 }
  0x41   :  { %290 = vmatpush3.bf16.msra.mxu1 %v307_v7  ;;  %261 = vmatpush3.bf16.msra.mxu0 %v307_v7 }
  0x42   :  { %283 = vmatprep.subr.bf16.mxu1 %v390_v0  ;;  %262 = vmatprep.subr.bf16.mxu0 %v390_v0 }
  0x45   :  { %291 = vmatpush3.bf16.msra.mxu1 %v308_v8  ;;  %263 = vmatpush3.bf16.msra.mxu0 %v308_v8 }
  0x48   :  { %269 = vmatmul.mubr.bf16.vlgmr.msra.gmra.mrb[0].mxu1 %v46_v9  ;;  %265 = vmatmul.mubr.bf16.vlgmr.msra.gmra.mrb[0].mxu0 %v44_v10 }
  0x49   :  { %272 = vmatprep.mubr.msk.bf16.mxu1 %vm391_vm0, %v390_v0 }
  0x50   :  { %273 = vmatmul.mubr.bf16.gmra.mrb[4].mxu1 %v228_v12 }
 0x11b   :  { %v178_v16 = vpop.f32.mrb[0].mxu1  ;;  %v170_v17 = vpop.f32.mrb[0].mxu0 }
 0x11c   :  { %v179_v18 = vadd.f32 %v225_v13, %v178_v16  ;;  %v270_v19 = vpop.f32.mrb[1].mxu1  ;;  %v171_v21 = vadd.f32 %v225_v13, %v170_v17  ;;  %v266_v22 = vpop.f32.mrb[1].mxu0 }
 0x11d   :  { %v181_v24 = vpop.f32.mrb[2].mxu1  ;;  %v173_v25 = vpop.f32.mrb[2].mxu0 }
 0x11e   :  { %v199_v26 = vadd.f32 %v194_v14, %v179_v18  ;;  %v182_v27 = vadd.f32 %v225_v13, %v181_v24  ;;  %v197_v28 = vadd.f32 %v192_v15, %v171_v21  ;;  %v271_v29 = vpop.f32.mrb[3].mxu1  ;;  %v174_v30 = vadd.f32 %v225_v13, %v173_v25  ;;  %v267_v31 = vpop.f32.mrb[3].mxu0 }
 0x120   :  { %204 = vst [vmem:[#allocation7 + $0x10] sm:$0xff] %v199_v26  ;;  %v200_v32 = vadd.f32 %v195_v20, %v182_v27  ;;  %202 = vst [vmem:[#allocation7] sm:$0xff] %v197_v28  ;;  %v198_v33 = vadd.f32 %v193_v23, %v174_v30 }
 0x122   :  { %205 = vst [vmem:[#allocation7 + $0x18] sm:$0xff] %v200_v32  ;;  %203 = vst [vmem:[#allocation7 + $0x8] sm:$0xff] %v198_v33 }
 0x123   :  { %v186_v35 = vpop.f32.mrb[4].mxu1 }
 0x124   :  { %v187_v36 = vadd.f32 %v225_v13, %v186_v35  ;;  %v274_v37 = vpop.f32.mrb[5].mxu1 }
 0x125   :  { %v189_v38 = vpop.f32.mrb[6].mxu1 }
 0x126   :  { %v201_v39 = vadd.f32 %v196_v34, %v187_v36  ;;  %v275_v40 = vpop.f32.mrb[7].mxu1 }
 0x128   :  { %206 = vst [vmem:[#allocation7 + $0x20] sm:$0xff] %v201_v39 }
 0x129   :  { %369 = shalt.err (!%p366_p6)
}
 0x12a   :  { %s370_s15 = scalar_lea.hbm %s460_s3, 640 }
 0x12b   :  { %p371_p7 = scmp.ne.s32.totalorder %s460_s3, %s370_s15  ;;  %p374_p8 = scmp.lt.u32.totalorder %s370_s15, %s460_s3 }
 0x12d   :  { %p376_p9 = pnand %p374_p8, %p371_p7 }
 0x12f   :  { %379 = shalt.err (!%p376_p9)
}
 0x130   :  { %s393_s20 = smov 128   ;;  %s394_s21 = smov 8  }
 0x131   :  { %218 = dma.vmem_to_hbm [thread:$0]  %s213_s11, 640, %s460_s3, [#allocation4], %s393_s20, %s393_s20, %s394_s21  }
 0x132   :  { %384 = dma.done.wait [#allocation4], 640  }
 0x133   :  { %385 = vsyncadd [#allocation4], 4294966656 }
 0x134   :  { %222 = vsyncpa [#allocation3], 1 }
 0x135   :  { %223 = vsyncpa [#allocation6], 1 }
 0x136   :  { %224 = vsyncpa [#allocation4], 1 }

</bundles_post_ra>
